<compile_context>
chip_gen: v7x
topology: tpu7x:2x2x1
jax: 0.10.0
libtpu: 0.0.40
codegen_flags: <defaults>
</compile_context>

<pallas_src>
import jax
import jax.numpy as jnp
from jax import lax
from jax.experimental import pallas as pl
from jax.experimental.pallas import tpu as pltpu

_LANES = 128


def _round_up(x, m):
    return ((x + m - 1) // m) * m


def _make_iou_kernel(n_chunks, ch):
    """Kernel over one (9, TR, 128) coordinate-major block.

    Slab rows: 0-3 = pred (x1,y1,x2,y2); 4-7 = target (x1,y1,x2,y2); 8 = weight.
    """

    def kernel(boxes_ref, out_ref, acc_ref):
        # Zero the dense (8,128) accumulator at the start of each shard.
        @pl.when(pl.program_id(1) == 0)
        def _():
            acc_ref[...] = jnp.zeros_like(acc_ref)

        def chunk(ci, carry):
            off = pl.multiple_of(ci * ch, ch)
            rows = pl.ds(off, ch)
            px1 = boxes_ref[0, rows, :]
            py1 = boxes_ref[1, rows, :]
            px2 = boxes_ref[2, rows, :]
            py2 = boxes_ref[3, rows, :]
            tx1 = boxes_ref[4, rows, :]
            ty1 = boxes_ref[5, rows, :]
            tx2 = boxes_ref[6, rows, :]
            ty2 = boxes_ref[7, rows, :]
            wgt = boxes_ref[8, rows, :]

            # Aligned IoU on fully dense (ch, 128) slabs.
            iw = jnp.maximum(jnp.minimum(px2, tx2) - jnp.maximum(px1, tx1), 0.0)
            ih = jnp.maximum(jnp.minimum(py2, ty2) - jnp.maximum(py1, ty1), 0.0)
            overlap = iw * ih
            area_p = (px2 - px1) * (py2 - py1)
            area_t = (tx2 - tx1) * (ty2 - ty1)
            ious = overlap / (area_p + area_t - overlap)   # exact divide (1e-5 tol)
            ious = jnp.maximum(ious, 1e-6)                 # clamp(min=1e-6)
            wlog = wgt * jnp.log(ious)                     # (ch, 128)

            # Fold sublane groups into an (8,128) partial with plain VPU adds.
            part = wlog[0:8, :]
            for j in range(1, ch // 8):
                part = part + wlog[j * 8:(j + 1) * 8, :]
            acc_ref[...] = acc_ref[...] + part
            return carry

        lax.fori_loop(0, n_chunks, chunk, 0, unroll=True)

        # One cross-lane/sublane reduce + one store per shard.
        @pl.when(pl.program_id(1) == pl.num_programs(1) - 1)
        def _():
            tot = jnp.sum(jnp.sum(acc_ref[...], axis=1, keepdims=True),
                          axis=0, keepdims=True)           # (1, 1)
            out_ref[0] = -tot                               # sum(w * -log(iou))

    return kernel


def iou_loss_pallas(pred, target, weight, avg_factor, *, tile_rows=1024):
    """pred, target: (K, 4) f32 xyxy boxes; weight: (K,); avg_factor: scalar."""
    k = pred.shape[0]
    f32 = jnp.float32

    # --- pack per-box record [px1,py1,px2,py2,tx1,ty1,tx2,ty2,w] -------------
    data = jnp.concatenate(
        [pred.astype(f32), target.astype(f32),
         weight.reshape(k, 1).astype(f32)], axis=1)          # (K, 9)

    # --- tiling choices -------------------------------------------------------
    r = pl.cdiv(k, _LANES)                                   # data rows of 128 boxes
    tr = min(int(tile_rows), _round_up(r, 8))
    tr = max(8, (tr // 8) * 8)                               # multiple of 8 sublanes
    ch = 32 if tr % 32 == 0 else (16 if tr % 16 == 0 else 8)  # chunk divides tr
    n_chunks = tr // ch

    n_shards = 2                                             # both TCs on v7x
    num_tiles = pl.cdiv(r, tr)
    tiles_per_shard = pl.cdiv(num_tiles, n_shards)
    r_pad = n_shards * tiles_per_shard * tr
    k_pad = r_pad * _LANES

    npad = k_pad - k
    if npad:
        # Dummy boxes (0,0,1,1)/(0,0,1,1): IoU == 1 -> log 0; weight 0.
        pad_row = jnp.array([0., 0., 1., 1., 0., 0., 1., 1., 0.], f32)
        data = jnp.concatenate(
            [data, jnp.broadcast_to(pad_row, (npad, 9))], axis=0)

    # TODO(synk): accept a coordinate-major (9, R, 128) slab from the producer
    # to eliminate this XLA-side transpose/relayout (dominant HBM cost left).
    slab = data.T.reshape(9, r_pad, _LANES)                  # (9, R_pad, 128)

    kernel = _make_iou_kernel(n_chunks, ch)
    cost = pl.CostEstimate(flops=20 * k_pad, transcendentals=k_pad,
                           bytes_accessed=9 * 4 * k_pad + 8 * n_shards)

    partial = pl.pallas_call(
        kernel,
        out_shape=jax.ShapeDtypeStruct((n_shards, 1, 1), f32),
        grid=(n_shards, tiles_per_shard),
        in_specs=[pl.BlockSpec((9, tr, _LANES),
                               lambda s, t: (0, s * tiles_per_shard + t, 0))],
        out_specs=pl.BlockSpec((1, 1, 1), lambda s, t: (s, 0, 0)),
        scratch_shapes=[pltpu.VMEM((8, _LANES), f32)],
        compiler_params=pltpu.CompilerParams(
            dimension_semantics=("parallel", "arbitrary"),
            vmem_limit_bytes=32 * 1024 * 1024),
        cost_estimate=cost,
    )(slab)

    total = jnp.sum(partial)                 # combine per-shard partial sums
    return total / (jnp.asarray(avg_factor, f32) + 1e-6)


def _iou_loss_ref(pred, target, weight, avg_factor):
    """Pure-JAX reference mirroring the PyTorch module."""
    area_p = (pred[:, 2] - pred[:, 0]) * (pred[:, 3] - pred[:, 1])
    area_t = (target[:, 2] - target[:, 0]) * (target[:, 3] - target[:, 1])
    iw = jnp.maximum(jnp.minimum(pred[:, 2], target[:, 2]) -
                     jnp.maximum(pred[:, 0], target[:, 0]), 0.0)
    ih = jnp.maximum(jnp.minimum(pred[:, 3], target[:, 3]) -
                     jnp.maximum(pred[:, 1], target[:, 1]), 0.0)
    overlap = iw * ih
    ious = overlap / (area_p + area_t - overlap)
    loss = -jnp.log(jnp.maximum(ious, 1e-6))
    loss = weight * loss
    return loss.sum() / (avg_factor + 1e-6)


def _make_inputs(K, key):
    k1, k2, k3, k4, k5 = jax.random.split(key, 5)
    # Deterministic, valid xyxy boxes (x2 > x1, y2 > y1).
    p_tl = jax.random.uniform(k1, (K, 2), jnp.float32, 0.0, 10.0)
    p_wh = jax.random.uniform(k2, (K, 2), jnp.float32, 1.0, 5.0)
    pred = jnp.concatenate([p_tl, p_tl + p_wh], axis=1)               # (K, 4)
    # Targets are jittered versions of pred so IoU is mostly > 0.
    jitter = jax.random.uniform(k3, (K, 2), jnp.float32, -0.5, 0.5)
    t_wh = p_wh + jax.random.uniform(k4, (K, 2), jnp.float32, -0.5, 0.5)
    t_tl = p_tl + jitter
    target = jnp.concatenate([t_tl, t_tl + jnp.maximum(t_wh, 0.5)], axis=1)
    weight = jax.random.uniform(k5, (K,), jnp.float32, 0.0, 1.0)      # centerness
    return pred, target, weight, jnp.float32(K)


if __name__ == "__main__":
    key = jax.random.PRNGKey(0)
    kA, kB = jax.random.split(key)

    # --- case 1: K not a multiple of 128 (exercises padding), default tiling.
    pred, target, weight, avg = _make_inputs(500, kA)
    ref = jax.block_until_ready(_iou_loss_ref(pred, target, weight, avg))
    out = jax.block_until_ready(iou_loss_pallas(pred, target, weight, avg))
    assert jnp.allclose(out, ref, rtol=1e-5, atol=1e-5), (out, ref)

    # --- case 2: larger K with tiny tiles -> multi-tile reduction on both
    #     shards (grid = 2 x 3) plus a padded dummy tile.
    pred2, target2, weight2, avg2 = _make_inputs(5000, kB)
    ref2 = jax.block_until_ready(_iou_loss_ref(pred2, target2, weight2, avg2))
    out2 = jax.block_until_ready(
        iou_loss_pallas(pred2, target2, weight2, avg2, tile_rows=8))
    assert jnp.allclose(out2, ref2, rtol=1e-5, atol=1e-5), (out2, ref2)

    # --- case 3: same data, default tile -> single block with multi-chunk
    #     inner loop (exercises the unrolled fori_loop path with n_chunks > 1).
    out3 = jax.block_until_ready(
        iou_loss_pallas(pred2, target2, weight2, avg2))
    assert jnp.allclose(out3, ref2, rtol=1e-5, atol=1e-5), (out3, ref2)

    print("KERNEL_OK")
</pallas_src>

<mosaic_0001>
module attributes {stable_mosaic.version = 11 : i64} {
  func.func @kernel(%arg0: i32, %arg1: i32, %arg2: memref<9x8x128xf32, #tpu.memory_space<vmem>>, %arg3: memref<1x1x1xf32, #tpu.memory_space<vmem>>, %arg4: memref<8x128xf32, #tpu.memory_space<vmem>>) attributes {dimension_semantics = [#tpu.dimension_semantics<parallel>, #tpu.dimension_semantics<arbitrary>], iteration_bounds = array<i64: 2, 1>, scalar_prefetch = 0 : i64, scratch_operands = 1 : i64, tpu.core_type = #tpu.core_type<tc>, window_params = [{transform_indices = @transform_0, window_bounds = array<i64: 9, 8, 128>}, {transform_indices = @transform_1, window_bounds = array<i64: 1, 1, 1>}]} {
    %c0_i32 = arith.constant 0 : i32
    %0 = arith.cmpi eq, %arg1, %c0_i32 : i32
    %1 = arith.extui %0 : i1 to i32
    %c0_i32_0 = arith.constant 0 : i32
    %2 = arith.cmpi ne, %1, %c0_i32_0 : i32
    scf.if %2 {
      %cst_19 = arith.constant 0.000000e+00 : f32
      %62 = vector.broadcast %cst_19 : f32 to vector<8x128xf32>
      %c0_20 = arith.constant 0 : index
      %c0_21 = arith.constant 0 : index
      %63 = vector.load %arg4[%c0_20, %c0_21] : memref<8x128xf32, #tpu.memory_space<vmem>>, vector<8x128xf32>
      tpu.vector_store %arg4[%c0_20, %c0_21], %62 {strides = array<i32>} : memref<8x128xf32, #tpu.memory_space<vmem>>, vector<8x128xf32>,
    } else {
    }
    %c0_i32_1 = arith.constant 0 : i32
    %c8_i32 = arith.constant 8 : i32
    %3 = arith.muli %c0_i32_1, %c8_i32 : i32
    %4 = tpu.assume_multiple %3, 8 : i32
    %c0 = arith.constant 0 : index
    %5 = arith.index_cast %4 : i32 to index
    %c0_2 = arith.constant 0 : index
    %6 = vector.load %arg2[%c0, %5, %c0_2] : memref<9x8x128xf32, #tpu.memory_space<vmem>>, vector<1x8x128xf32>
    %7 = vector.shape_cast %6 : vector<1x8x128xf32> to vector<8x128xf32>
    %c1 = arith.constant 1 : index
    %8 = arith.index_cast %4 : i32 to index
    %c0_3 = arith.constant 0 : index
    %9 = vector.load %arg2[%c1, %8, %c0_3] : memref<9x8x128xf32, #tpu.memory_space<vmem>>, vector<1x8x128xf32>
    %10 = vector.shape_cast %9 : vector<1x8x128xf32> to vector<8x128xf32>
    %c2 = arith.constant 2 : index
    %11 = arith.index_cast %4 : i32 to index
    %c0_4 = arith.constant 0 : index
    %12 = vector.load %arg2[%c2, %11, %c0_4] : memref<9x8x128xf32, #tpu.memory_space<vmem>>, vector<1x8x128xf32>
    %13 = vector.shape_cast %12 : vector<1x8x128xf32> to vector<8x128xf32>
    %c3 = arith.constant 3 : index
    %14 = arith.index_cast %4 : i32 to index
    %c0_5 = arith.constant 0 : index
    %15 = vector.load %arg2[%c3, %14, %c0_5] : memref<9x8x128xf32, #tpu.memory_space<vmem>>, vector<1x8x128xf32>
    %16 = vector.shape_cast %15 : vector<1x8x128xf32> to vector<8x128xf32>
    %c4 = arith.constant 4 : index
    %17 = arith.index_cast %4 : i32 to index
    %c0_6 = arith.constant 0 : index
    %18 = vector.load %arg2[%c4, %17, %c0_6] : memref<9x8x128xf32, #tpu.memory_space<vmem>>, vector<1x8x128xf32>
    %19 = vector.shape_cast %18 : vector<1x8x128xf32> to vector<8x128xf32>
    %c5 = arith.constant 5 : index
    %20 = arith.index_cast %4 : i32 to index
    %c0_7 = arith.constant 0 : index
    %21 = vector.load %arg2[%c5, %20, %c0_7] : memref<9x8x128xf32, #tpu.memory_space<vmem>>, vector<1x8x128xf32>
    %22 = vector.shape_cast %21 : vector<1x8x128xf32> to vector<8x128xf32>
    %c6 = arith.constant 6 : index
    %23 = arith.index_cast %4 : i32 to index
    %c0_8 = arith.constant 0 : index
    %24 = vector.load %arg2[%c6, %23, %c0_8] : memref<9x8x128xf32, #tpu.memory_space<vmem>>, vector<1x8x128xf32>
    %25 = vector.shape_cast %24 : vector<1x8x128xf32> to vector<8x128xf32>
    %c7 = arith.constant 7 : index
    %26 = arith.index_cast %4 : i32 to index
    %c0_9 = arith.constant 0 : index
    %27 = vector.load %arg2[%c7, %26, %c0_9] : memref<9x8x128xf32, #tpu.memory_space<vmem>>, vector<1x8x128xf32>
    %28 = vector.shape_cast %27 : vector<1x8x128xf32> to vector<8x128xf32>
    %c8 = arith.constant 8 : index
    %29 = arith.index_cast %4 : i32 to index
    %c0_10 = arith.constant 0 : index
    %30 = vector.load %arg2[%c8, %29, %c0_10] : memref<9x8x128xf32, #tpu.memory_space<vmem>>, vector<1x8x128xf32>
    %31 = vector.shape_cast %30 : vector<1x8x128xf32> to vector<8x128xf32>
    %32 = arith.minimumf %13, %25 : vector<8x128xf32>
    %33 = arith.maximumf %7, %19 : vector<8x128xf32>
    %34 = arith.subf %32, %33 : vector<8x128xf32>
    %cst = arith.constant 0.000000e+00 : f32
    %35 = vector.broadcast %cst : f32 to vector<8x128xf32>
    %36 = arith.maximumf %34, %35 : vector<8x128xf32>
    %37 = arith.minimumf %16, %28 : vector<8x128xf32>
    %38 = arith.maximumf %10, %22 : vector<8x128xf32>
    %39 = arith.subf %37, %38 : vector<8x128xf32>
    %cst_11 = arith.constant 0.000000e+00 : f32
    %40 = vector.broadcast %cst_11 : f32 to vector<8x128xf32>
    %41 = arith.maximumf %39, %40 : vector<8x128xf32>
    %42 = arith.mulf %36, %41 : vector<8x128xf32>
    %43 = arith.subf %13, %7 : vector<8x128xf32>
    %44 = arith.subf %16, %10 : vector<8x128xf32>
    %45 = arith.mulf %43, %44 : vector<8x128xf32>
    %46 = arith.subf %25, %19 : vector<8x128xf32>
    %47 = arith.subf %28, %22 : vector<8x128xf32>
    %48 = arith.mulf %46, %47 : vector<8x128xf32>
    %49 = arith.addf %45, %48 : vector<8x128xf32>
    %50 = arith.subf %49, %42 : vector<8x128xf32>
    %51 = arith.divf %42, %50 : vector<8x128xf32>
    %cst_12 = arith.constant 9.99999997E-7 : f32
    %52 = vector.broadcast %cst_12 : f32 to vector<8x128xf32>
    %53 = arith.maximumf %51, %52 : vector<8x128xf32>
    %54 = math.log %53 : vector<8x128xf32>
    %55 = arith.mulf %31, %54 : vector<8x128xf32>
    %c0_13 = arith.constant 0 : index
    %c0_14 = arith.constant 0 : index
    %56 = vector.load %arg4[%c0_13, %c0_14] : memref<8x128xf32, #tpu.memory_space<vmem>>, vector<8x128xf32>
    %57 = arith.addf %56, %55 : vector<8x128xf32>
    %c0_15 = arith.constant 0 : index
    %c0_16 = arith.constant 0 : index
    %58 = vector.load %arg4[%c0_15, %c0_16] : memref<8x128xf32, #tpu.memory_space<vmem>>, vector<8x128xf32>
    tpu.vector_store %arg4[%c0_15, %c0_16], %57 {strides = array<i32>} : memref<8x128xf32, #tpu.memory_space<vmem>>, vector<8x128xf32>,
    %c1_i32 = arith.constant 1 : i32
    %c0_i32_17 = arith.constant 0 : i32
    %59 = arith.cmpi eq, %arg1, %c0_i32_17 : i32
    %60 = arith.extui %59 : i1 to i32
    %c0_i32_18 = arith.constant 0 : i32
    %61 = arith.cmpi ne, %60, %c0_i32_18 : i32
    scf.if %61 {
      %c0_19 = arith.constant 0 : index
      %c0_20 = arith.constant 0 : index
      %62 = vector.load %arg4[%c0_19, %c0_20] : memref<8x128xf32, #tpu.memory_space<vmem>>, vector<8x128xf32>
      %cst_21 = arith.constant dense<0.000000e+00> : vector<8xf32>
      %63 = vector.multi_reduction <add>, %62, %cst_21 [1] : vector<8x128xf32> to vector<8xf32>
      %64 = vector.shape_cast %63 : vector<8xf32> to vector<8x1xf32>
      %cst_22 = arith.constant dense<0.000000e+00> : vector<1xf32>
      %65 = vector.multi_reduction <add>, %64, %cst_22 [0] : vector<8x1xf32> to vector<1xf32>
      %66 = vector.shape_cast %65 : vector<1xf32> to vector<1x1xf32>
      %cst_23 = arith.constant 0.000000e+00 : f32
      %67 = vector.broadcast %cst_23 : f32 to vector<1x1xf32>
      %68 = arith.subf %67, %66 : vector<1x1xf32>
      %c0_24 = arith.constant 0 : index
      %c0_25 = arith.constant 0 : index
      %c0_26 = arith.constant 0 : index
      %69 = vector.load %arg3[%c0_24, %c0_25, %c0_26] : memref<1x1x1xf32, #tpu.memory_space<vmem>>, vector<1x1x1xf32>
      %70 = vector.shape_cast %69 : vector<1x1x1xf32> to vector<1x1xf32>
      %71 = vector.shape_cast %68 : vector<1x1xf32> to vector<1x1x1xf32>
      tpu.vector_store %arg3[%c0_24, %c0_25, %c0_26], %71 {strides = array<i32>} : memref<1x1x1xf32, #tpu.memory_space<vmem>>, vector<1x1x1xf32>,
    } else {
    }
    return
  }
  func.func @transform_0(%arg0: i32, %arg1: i32) -> (i32, i32, i32) {
    %c1_i32 = arith.constant 1 : i32
    %0 = arith.muli %arg0, %c1_i32 : i32
    %1 = arith.addi %0, %arg1 : i32
    %c0_i32 = arith.constant 0 : i32
    %c0_i32_0 = arith.constant 0 : i32
    %c0_i32_1 = arith.constant 0 : i32
    return %c0_i32, %1, %c0_i32_0 : i32, i32, i32
  }
  func.func @transform_1(%arg0: i32, %arg1: i32) -> (i32, i32, i32) {
    %c0_i32 = arith.constant 0 : i32
    %c0_i32_0 = arith.constant 0 : i32
    %c0_i32_1 = arith.constant 0 : i32
    return %arg0, %c0_i32, %c0_i32_0 : i32, i32, i32
  }
}

</mosaic_0001>

<bundles_post_ra>
// kernel: tpu_custom_call.1
= control target key start
LH: loop header
LB: loop body
LE: loop exit
PB: predicated region body
PF: predicated region fallthrough
CT: control target
= control target key end

     0   :  { %6 = vsyncpa [#allocation4], 0  ;;  %s602_s0 = inlined_call_operand.hbm [shape: f32[9,16,128], index: 0, kind: input, shape index: {}]   ;;  %s603_s1 = inlined_call_operand.vmem [shape: f32[2,1,1], index: 1, kind: output, shape index: {}]  }
   0x1   :  { %8 = vsyncpa [#allocation4 + $0x1], 0  ;;  %s471_s6 = smov 0   ;;  %s473_s7 = smov 0  }
   0x2   :  { %s475_s8 = smov 0   ;;  %s477_s9 = smov 0  }
   0x3   :  { %s479_s10 = smov 0   ;;  %s481_s11 = smov 0  }
   0x4 LB: > { %s295_s12 = sadd.s32 4294967295, %s455_s11   ;;  %s26_s13 = sadd.s32 1, %s451_s10  ;;  %s455_s11 = sphi %s481_s11, %s14_s11   ;;  %s451_s10 = sphi %s479_s10, %s611_s10   ;;  %s447_s9 = sphi %s477_s9, %s610_s9   ;;  %s443_s8 = sphi %s475_s8, %s609_s8   ;;  %s439_s7 = sphi %s473_s7, %s608_s7   ;;  %s435_s6 = sphi %s471_s6, %s607_s6  }
   0x5   : > { %p28_p0 = scmp.ge.s32.totalorder %s26_s13, 2  ;;  %s35_s14 = sadd.s32 1, %s443_s8 }
   0x6   : > { %p42_p1 = scmp.ne.s32.totalorder %s443_s8, %s439_s7  ;;  %p43_p2 = scmp.eq.s32.totalorder %s455_s11, 0 }
   0x7   : > { %s613_s13 = smov (%p28_p0, %s26_s13), 0  ;;  %p48_p4 = scmp.ne.s32.totalorder %s439_s7, %s435_s6 }
   0x8   : > { %p44_p3 = por %p43_p2, %p42_p1  ;;  %s32_s15 = ssub.s32 %s451_s10, %s613_s13 }
   0x9   : > { %p49_p5 = scmp.eq.s32.totalorder %s295_s12, 0  ;;  %p33_p6 = scmp.eq.s32.totalorder %s32_s15, 0 }
   0xa   : > { %p319_p8 = scmp.lt.s32.totalorder %s455_s11, 2  ;;  %s98_s18 = sand.u32 1, %s443_s8  }
   0xb   : > { %p510_p7 = por %p49_p5, %p48_p4  ;;  %s299_s19 = sshll.u32 %s451_s10, 7 }
   0xc   : > { %s516_s17 = scalar_select %p33_p6, %s443_s8, %s35_s14  }
   0xd   : > { %s311_s20 = smul.u32 72, %s98_s18  ;;  %s523_s23 = scalar_lea.hbm %s602_s0, %s299_s19 }
   0xe   : > { %p525_p9 = pnand %p319_p8, %p44_p3  ;;  %s532_s27 = scalar_lea.sflag [#allocation4], %s98_s18 }
   0xf   : > { %s102_s25 = scalar_lea.vmem [#allocation3], %s311_s20  ;;  %s375_s28 = scalar_lea.hbm %s523_s23, 1152 }
  0x10   : > { %s109_s26 = sshll.u32 %s102_s25, 4  ;;  %p376_p11 = scmp.ne.s32.totalorder %s523_s23, %s375_s28  ;;  %s529_s26 = int_to_ptr.vmem [resolvable:$true] %s109_s26 }
  0x11   : > { %p377_p12 = pneg %p525_p9  ;;  %s380_s2 = scalar_lea.hbm %s602_s0, 2304 }
  0x12   : > { %p381_p1 = scmp.lt.u32.totalorder %s523_s23, %s602_s0  ;;  %p382_p2 = scmp.lt.u32.totalorder %s380_s2, %s375_s28 }
  0x13   : > { %p378_p13 = pnand %p377_p12, %p376_p11  ;;  %p384_p4 = scmp.lt.u32.totalorder %s375_s28, %s523_s23 }
  0x14   : > { %p383_p3 = por %p382_p2, %p381_p1 }
  0x15   : > { %p379_p0 = pneg %p378_p13 }
  0x16   : > { %p385_p5 = por %p384_p4, %p383_p3 }
  0x18   : > { %p386_p6 = pnand %p385_p5, %p379_p0 }
  0x1a   : > { %389 = shalt.err (!%p386_p6)
}
  0x1b   : > { %s390_s5 = scalar_lea.vmem %s529_s26, 1152  ;;  %s457_s6 = smov [#allocation3]  }
  0x1c   : > { %p391_p8 = scmp.ne.s32.totalorder %s529_s26, %s390_s5  ;;  %s395_s12 = sshll.u32 %s457_s6, 4  ;;  %s396_s12 = int_to_ptr.vmem [resolvable:$false] %s395_s12 }
  0x1d   : > { %s397_s14 = scalar_lea.vmem %s396_s12, 2304  ;;  %p398_p10 = scmp.lt.s32.totalorder %s529_s26, %s396_s12 }
  0x1e   : > { %p393_p11 = pnand %p391_p8, %p377_p12  ;;  %p399_p1 = scmp.lt.s32.totalorder %s397_s14, %s390_s5 }
  0x20   : > { %p394_p13 = pneg %p393_p11  ;;  %p400_p2 = por %p399_p1, %p398_p10 }
  0x22   : > { %p401_p3 = pnand %p400_p2, %p394_p13 }
  0x24   : > { %404 = shalt.err (!%p401_p3)
}
  0x25   : > { %s458_s15 = smov 256   ;;  %s459_s18 = smov 128  }
  0x26   : > { %s460_s19 = smov 8   ;;  %p117_p12 = scmp.lt.s32.totalorder %s455_s11, 3 }
  0x27   : > { %318 = dma.hbm_to_vmem [thread:$0]  (!%p525_p9), %s523_s23, 1152, %s529_s26, %s532_s27, %s458_s15, %s459_s18, %s460_s19  }
  0x28   : > { %p606_p0 = scmp.ge.s32.totalorder %s455_s11, 1 }
  0x2a   : > { %p118_p4 = pnand %p606_p0, %p117_p12 }
  0x2b   : > { %s123_s20 = sand.u32 (!%p118_p4), 1, %s439_s7  }
  0x2c   : > { %121 = sbr.rel (%p118_p4) target bundleno = 252 (0xfc), region = 24  ;;  %s124_s22 = scalar_lea.sflag (!%p118_p4), [#allocation4], %s123_s20 }
  0x2d   : > { %s312_s21 = smul.u32 (!%p118_p4), 72, %s123_s20 }
  0x2f   : > { %s564_s25 = scalar_lea.vmem (!%p118_p4), [#allocation3], %s312_s21 }
  0x33   : > { %430 = dma.done.wait (%p510_p7), %s124_s22, 1152  }
  0x34   : > { %432 = vsyncadd (%p510_p7), %s124_s22, 4294966144  ;;  %v153_v0 = vld [vmem:[%s564_s25] sm:$0xff]  ;;  %v301_v1 = vld [vmem:[%s564_s25 + $0x8] sm:$0xff]  ;;  %p145_p7 = scmp.lt.s32.totalorder %s447_s9, 1  ;;  %vm217_vm0 = vcmask 0  }
  0x35   : > { %v302_v2 = vld [vmem:[%s564_s25 + $0x10] sm:$0xff]  ;;  %v303_v3 = vld [vmem:[%s564_s25 + $0x18] sm:$0xff]  ;;  %v304_v4 = vld [vmem:[%s564_s25 + $0x20] sm:$0xff] }
  0x36   : > { %v305_v5 = vld [vmem:[%s564_s25 + $0x28] sm:$0xff]  ;;  %v187_v6 = vsub.f32 %v302_v2, %v153_v0  ;;  %v306_v7 = vld [vmem:[%s564_s25 + $0x30] sm:$0xff]  ;;  %v307_v8 = vld [vmem:[%s564_s25 + $0x38] sm:$0xff]  ;;  %v179_v9 = vmax.f32 %v153_v0, %v304_v4  ;;  %v188_v11 = vsub.f32 %v303_v3, %v301_v1  ;;  %s615_s9 = smov (!%p145_p7, %s447_s9), 1 }
  0x37   : > { %v183_v10 = vmax.f32 %v301_v1, %v305_v5  ;;  %v178_v12 = vmin.f32 %v302_v2, %v306_v7  ;;  %v182_v13 = vmin.f32 %v303_v3, %v307_v8  ;;  %v190_v14 = vsub.f32 %v306_v7, %v304_v4  ;;  %v308_v29 = vld [vmem:[%s564_s25 + $0x40] sm:$0xff]  ;;  %s147_s24 = scalar_lea.vmem %s603_s1, %s615_s9 }
  0x38   : > { %v191_v15 = vsub.f32 %v307_v8, %v305_v5  ;;  %v189_v16 = vmul.f32 %v188_v11, %v187_v6 }
  0x39   : > { %v180_v17 = vsub.f32 %v178_v12, %v179_v9  ;;  %v184_v18 = vsub.f32 %v182_v13, %v183_v10 }
  0x3a   : > { %v192_v19 = vmul.f32 %v191_v15, %v190_v14 }
  0x3b   : > { %v181_v20 = vmax.f32 %v180_v17, 0.0  ;;  %v185_v21 = vmax.f32 %v184_v18, 0.0 }
  0x3c   : > { %v193_v22 = vadd.f32 %v192_v19, %v189_v16 }
  0x3d   : > { %v186_v23 = vmul.f32 %v185_v21, %v181_v20 }
  0x3f   : > { %v194_v24 = vsub.f32 %v193_v22, %v186_v23 }
  0x41   : > { %371 = vrcp.f32 %v194_v24 }
  0x4b   : > { %v372_v25 = vpop.eup %371 }
  0x4c   : > { %v196_v26 = vmul.f32 %v372_v25, %v186_v23 }
  0x4e   : > { %v197_v27 = vmax.f32 %v196_v26, 1e-06 }
  0x50   : > { %373 = vlog2.f32 %v197_v27 }
  0x5a   : > { %v374_v28 = vpop.eup %373 }
  0x5b   : > { %v199_v30 = vmul.f32 0.6931472, %v374_v28 }
  0x5d   : > { %v200_v31 = vmul.f32 %v308_v29, %v199_v30 }
  0x5f   : > { %208 = vadd.xlane.f32.xlu0 %v200_v31 }
  0xec   : > { %v209_v32 = vpop.xlane.xlu0 %208 }
  0xed   : > { %v210_v33 = vrot.slane %v209_v32, 4 }
  0xef   : > { %v211_v34 = vadd.f32 %v210_v33, %v209_v32 }
  0xf1   : > { %v212_v35 = vrot.slane %v211_v34, 2 }
  0xf3   : > { %v213_v36 = vadd.f32 %v212_v35, %v211_v34 }
  0xf5   : > { %v214_v37 = vrot.slane %v213_v36, 1 }
  0xf7   : > { %v215_v38 = vadd.f32 %v214_v37, %v213_v36 }
  0xf9   : > { %v216_v39 = vsub.f32 0.0, %v215_v38 }
  0xfb   : > { %218 = vst.msk [vmem:[%s147_s24] sm:$0x1] %vm217_vm0, %v216_v39 }
  0xfc PF: > { %s14_s11 = sadd.s32 1, %s455_s11   ;;  %s607_s6 = smov %s439_s7 }
  0xfd   : > { %p11_p9 = scmp.ge.s32.totalorder %s14_s11, 4   ;;  %s608_s7 = smov %s443_s8 }
  0xfe   : > { %s609_s8 = smov %s516_s17  ;;  %s610_s9 = smov %s451_s10 }
  0xff   : > { %s611_s10 = smov %s613_s13  ;;  %13 = sbr.rel (!%p11_p9) target bundleno = 4 (0x4), region = 80 }
 0x106   :  { %236 = vsyncpa [#allocation4], 1 }
 0x107   :  { %238 = vsyncpa [#allocation4 + $0x1], 1 }

</bundles_post_ra>
